<compile_context>
chip_gen: v5e
topology: v5e:2x2
jax: 0.10.0
libtpu: 0.0.40
codegen_flags: <defaults>
</compile_context>

<pallas_src>
import functools

import jax
import jax.numpy as jnp
from jax import lax
from jax.experimental import pallas as pl
from jax.experimental.pallas import tpu as pltpu


def _tv_kernel(x_ref, out_ref, *, p, h, w, chunk, bc):
    """One grid step: partial TV sums over a (p, h*w) block of flattened planes."""
    hw = h * w
    n_slabs = p // chunk
    needs_mask = (bc % p) != 0        # static: only a ragged global tail needs masking

    # Hoisted iotas / masks (JAX does not CSE broadcast_in_dim inside loops).
    if w > 1:
        col = lax.broadcasted_iota(jnp.int32, (chunk, hw - 1), 1)
        not_wrap = ((col % w) != (w - 1)).astype(jnp.float32)
    if needs_mask:
        row = lax.broadcasted_iota(jnp.int32, (chunk, 1), 0) + pl.program_id(0) * p

    zero = jnp.zeros((1, 1), jnp.float32)

    def slab_sums(start):
        slab = x_ref[pl.ds(start, chunk), :]
        if needs_mask:
            # Zero out planes past the end of the real (bc, hw) array.
            slab = jnp.where(row + start < bc, slab, jnp.zeros_like(slab))
        slab = slab.astype(jnp.float32)
        if h > 1:
            # Vertical neighbours: lane shift of W within each flattened plane.
            dh = slab[:, w:] - slab[:, : hw - w]
            h_s = jnp.sum(dh * dh, keepdims=True)
        else:
            h_s = zero
        if w > 1:
            # Horizontal neighbours: lane shift of 1; mask the row-wrap lanes.
            dw = (slab[:, 1:] - slab[:, : hw - 1]) * not_wrap
            w_s = jnp.sum(dw * dw, keepdims=True)
        else:
            w_s = zero
        return h_s, w_s

    if n_slabs == 1:
        h_acc, w_acc = slab_sums(0)
    else:
        def body(s, carry):
            ha, wa = carry
            start = pl.multiple_of(s * chunk, chunk)
            hs, ws = slab_sums(start)
            return ha + hs, wa + ws

        h_acc, w_acc = lax.fori_loop(0, n_slabs, body, (zero, zero))

    out_ref[...] = jnp.concatenate([h_acc, w_acc], axis=1)   # (1, 2) partial sums


def tv_loss(x, tv_loss_weight=1.0):
    """Total-variation loss, identical semantics to the PyTorch TVLoss module."""
    b, c, h, w = x.shape
    bc = b * c
    hw = h * w
    itemsize = x.dtype.itemsize
    plane_bytes = hw * itemsize

    planes = x.reshape(bc, hw)        # contiguous reshape: no HBM copy

    # ---- choose planes-per-block (p) -----------------------------------------
    target_block_bytes = 8 * 1024 * 1024        # ~8 MiB input per grid step
    if plane_bytes >= target_block_bytes:
        # TODO(synk): planes larger than the block budget need H-tiling with a
        # one-row halo; fall back to one plane per block (may exceed VMEM for
        # extremely large planes).
        p = 1
    elif bc * plane_bytes <= 2 * 1024 * 1024:
        # Tiny input: one block covering the full plane extent (layout-legal,
        # temporaries bounded by the tiny total size anyway).
        p = bc
    else:
        p = min(target_block_bytes // plane_bytes, max(1, bc // 4), bc)
        if p < bc:
            p8 = max(8, (p // 8) * 8)           # sublane-aligned blocks
            if p8 * plane_bytes <= 2 * target_block_bytes:
                p = min(p8, bc)
    nb = pl.cdiv(bc, p)

    # ---- rows per in-kernel reduction slab (~1 MiB of f32 per slab) ----------
    slab_cap = max(1, (1024 * 1024) // (hw * 4))
    if p <= slab_cap or p % 8 != 0:
        chunk = p
    else:
        chunk = max(8, (min(slab_cap, p) // 8) * 8)
        while p % chunk:
            chunk -= 8

    n_elems = bc * hw
    cost = pl.CostEstimate(
        flops=6 * n_elems,                       # ~2 sub + 2 mul + 2 add per element
        transcendentals=0,
        bytes_accessed=n_elems * itemsize + nb * 2 * 4,
    )

    kernel = functools.partial(_tv_kernel, p=p, h=h, w=w, chunk=chunk, bc=bc)

    parts = pl.pallas_call(
        kernel,
        out_shape=jax.ShapeDtypeStruct((nb, 2), jnp.float32),
        grid_spec=pltpu.PrefetchScalarGridSpec(
            num_scalar_prefetch=0,
            grid=(nb,),
            in_specs=[pl.BlockSpec((p, hw), lambda i: (i, 0))],
            out_specs=pl.BlockSpec((1, 2), lambda i: (i, 0)),
        ),
        compiler_params=pltpu.CompilerParams(
            dimension_semantics=("parallel",),   # independent blocks -> megacore-shardable
            vmem_limit_bytes=32 * 1024 * 1024,
        ),
        cost_estimate=cost,
    )(planes)

    h_tv = jnp.sum(parts[:, 0])
    w_tv = jnp.sum(parts[:, 1])

    # Same epilogue as the PyTorch module (including its h==1 / w==1
    # divide-by-zero flaw).
    count_h = c * (h - 1) * w
    count_w = c * h * (w - 1)
    return tv_loss_weight * 2.0 * (h_tv / count_h + w_tv / count_w) / b


def _tv_loss_ref(x, tv_loss_weight=1.0):
    b, c, h, w = x.shape
    count_h = c * (h - 1) * w
    count_w = c * h * (w - 1)
    h_tv = jnp.sum((x[:, :, 1:, :] - x[:, :, :-1, :]) ** 2)
    w_tv = jnp.sum((x[:, :, :, 1:] - x[:, :, :, :-1]) ** 2)
    return tv_loss_weight * 2.0 * (h_tv / count_h + w_tv / count_w) / b


if __name__ == "__main__":
    key = jax.random.PRNGKey(0)
    x = jax.random.normal(key, (2, 4, 16, 16), dtype=jnp.float32)  # NCHW

    out = tv_loss(x, tv_loss_weight=1.0)
    out = jax.block_until_ready(out)

    ref = _tv_loss_ref(x, tv_loss_weight=1.0)
    assert jnp.allclose(out, ref, rtol=1e-5, atol=1e-5), (out, ref)
    print("KERNEL_OK")
</pallas_src>

<mosaic_0001>
module attributes {stable_mosaic.version = 11 : i64} {
  func.func @_tv_kernel(%arg0: i32, %arg1: memref<8x256xf32, #tpu.memory_space<vmem>>, %arg2: memref<1x2xf32, #tpu.memory_space<vmem>>) attributes {dimension_semantics = [#tpu.dimension_semantics<parallel>], iteration_bounds = array<i64: 1>, scalar_prefetch = 0 : i64, scratch_operands = 0 : i64, tpu.core_type = #tpu.core_type<tc>, window_params = [{transform_indices = @transform_0, window_bounds = array<i64: 8, 256>}, {transform_indices = @transform_1, window_bounds = array<i64: 1, 2>}]} {
    %0 = tpu.iota {dimensions = array<i32: 1>} : vector<8x255xi32>
    %c16_i32 = arith.constant 16 : i32
    %c0_i32 = arith.constant 0 : i32
    %1 = arith.cmpi eq, %c16_i32, %c0_i32 : i32
    %c1_i32 = arith.constant 1 : i32
    %2 = arith.select %1, %c1_i32, %c16_i32 : i32
    %3 = vector.broadcast %2 : i32 to vector<8x255xi32>
    %4 = arith.remsi %0, %3 : vector<8x255xi32>
    %c0_i32_0 = arith.constant 0 : i32
    %5 = vector.broadcast %c0_i32_0 : i32 to vector<8x255xi32>
    %6 = arith.cmpi ne, %4, %5 : vector<8x255xi32>
    %c0_i32_1 = arith.constant 0 : i32
    %7 = vector.broadcast %c0_i32_1 : i32 to vector<8x255xi32>
    %8 = arith.cmpi slt, %4, %7 : vector<8x255xi32>
    %c0_i32_2 = arith.constant 0 : i32
    %9 = arith.cmpi slt, %2, %c0_i32_2 : i32
    %10 = vector.broadcast %9 : i1 to vector<8x255xi1>
    %11 = vector.broadcast %10 : vector<8x255xi1> to vector<8x255xi1>
    %12 = arith.xori %8, %11 : vector<8x255xi1>
    %13 = arith.andi %12, %6 : vector<8x255xi1>
    %14 = vector.broadcast %2 : i32 to vector<8x255xi32>
    %15 = arith.addi %4, %14 : vector<8x255xi32>
    %16 = arith.select %13, %15, %4 : vector<8x255xi1>, vector<8x255xi32>
    %c15_i32 = arith.constant 15 : i32
    %17 = vector.broadcast %c15_i32 : i32 to vector<8x255xi32>
    %18 = arith.cmpi ne, %16, %17 : vector<8x255xi32>
    %19 = arith.extui %18 : vector<8x255xi1> to vector<8x255xi32>
    %20 = arith.sitofp %19 : vector<8x255xi32> to vector<8x255xf32>
    %c0 = arith.constant 0 : index
    %c0_3 = arith.constant 0 : index
    %21 = vector.load %arg1[%c0, %c0_3] : memref<8x256xf32, #tpu.memory_space<vmem>>, vector<8x256xf32>
    %22 = vector.extract_strided_slice %21 {offsets = [0, 16], sizes = [8, 240], strides = [1, 1]} : vector<8x256xf32> to vector<8x240xf32>
    %23 = vector.extract_strided_slice %21 {offsets = [0, 0], sizes = [8, 240], strides = [1, 1]} : vector<8x256xf32> to vector<8x240xf32>
    %24 = arith.subf %22, %23 : vector<8x240xf32>
    %25 = arith.mulf %24, %24 : vector<8x240xf32>
    %26 = vector.shape_cast %25 : vector<8x240xf32> to vector<1x8x240xf32>
    %cst = arith.constant dense<0.000000e+00> : vector<1xf32>
    %27 = vector.multi_reduction <add>, %26, %cst [1, 2] : vector<1x8x240xf32> to vector<1xf32>
    %28 = vector.shape_cast %27 : vector<1xf32> to vector<1x1x1xf32>
    %29 = vector.extract %28[0, 0, 0] : f32 from vector<1x1x1xf32>
    %30 = vector.broadcast %29 : f32 to vector<1x1xf32>
    %31 = vector.extract_strided_slice %21 {offsets = [0, 1], sizes = [8, 255], strides = [1, 1]} : vector<8x256xf32> to vector<8x255xf32>
    %32 = vector.extract_strided_slice %21 {offsets = [0, 0], sizes = [8, 255], strides = [1, 1]} : vector<8x256xf32> to vector<8x255xf32>
    %33 = arith.subf %31, %32 : vector<8x255xf32>
    %34 = arith.mulf %33, %20 : vector<8x255xf32>
    %35 = arith.mulf %34, %34 : vector<8x255xf32>
    %36 = vector.shape_cast %35 : vector<8x255xf32> to vector<1x8x255xf32>
    %cst_4 = arith.constant dense<0.000000e+00> : vector<1xf32>
    %37 = vector.multi_reduction <add>, %36, %cst_4 [1, 2] : vector<1x8x255xf32> to vector<1xf32>
    %38 = vector.shape_cast %37 : vector<1xf32> to vector<1x1x1xf32>
    %39 = vector.extract %38[0, 0, 0] : f32 from vector<1x1x1xf32>
    %40 = vector.broadcast %39 : f32 to vector<1x1xf32>
    %41 = tpu.concatenate %30, %40 in 1 : vector<1x1xf32>, vector<1x1xf32> -> vector<1x2xf32>
    %c0_5 = arith.constant 0 : index
    %c0_6 = arith.constant 0 : index
    %42 = vector.load %arg2[%c0_5, %c0_6] : memref<1x2xf32, #tpu.memory_space<vmem>>, vector<1x2xf32>
    tpu.vector_store %arg2[%c0_5, %c0_6], %41 {strides = array<i32>} : memref<1x2xf32, #tpu.memory_space<vmem>>, vector<1x2xf32>,
    return
  }
  func.func @transform_0(%arg0: i32) -> (i32, i32) {
    %c0_i32 = arith.constant 0 : i32
    %c0_i32_0 = arith.constant 0 : i32
    return %arg0, %c0_i32 : i32, i32
  }
  func.func @transform_1(%arg0: i32) -> (i32, i32) {
    %c0_i32 = arith.constant 0 : i32
    %c0_i32_0 = arith.constant 0 : i32
    return %arg0, %c0_i32 : i32, i32
  }
}

</mosaic_0001>

<bundles_post_ra>
// kernel: tpu_custom_call.1
= control target key start
LH: loop header
LB: loop body
LE: loop exit
PB: predicated region body
PF: predicated region fallthrough
CT: control target
= control target key end

     0   :  { %6 = vsyncpa [#allocation3], 0  ;;  %s255_s0 = inlined_call_operand.hbm [shape: f32[8,256], index: 0, kind: input, shape index: {}]   ;;  %s256_s1 = inlined_call_operand.hbm [shape: f32[1,2], index: 1, kind: output, shape index: {}]  }
   0x1   :  { %7 = vsyncpa [#allocation4], 0  ;;  %s13_s8 = sshll.u32 %s255_s0, 4  ;;  %s229_s9 = smov [#allocation2]   ;;  %s14_s8 = int_to_ptr.hbm [resolvable:$true] %s13_s8 }
   0x2   :  { %s15_s10 = sshll.u32 %s229_s9, 4  ;;  %s16_s10 = int_to_ptr.vmem [resolvable:$true] %s15_s10 }
   0x3   :  { %18 = dma.hbm_to_vmem [thread:$0]  %s14_s8, 256, %s16_s10, [#allocation3]  }
   0x4   :  { %225 = dma.done.wait [#allocation3], 256  }
   0x5   :  { %226 = vsyncadd [#allocation3], 4294967040  ;;  %v23_v0 = vlaneseq  ;;  %v56_v5 = vld [vmem:[#allocation2] sm:$0xff]  ;;  %v230_v6 = vmov 0.0   ;;  %s231_s11 = smov 16   ;;  %s232_s12 = smov 1  }
   0x6   :  { %60 = vrot.lane.b32.xlu1 %v56_v5, %s231_s11  ;;  %94 = vrot.lane.b32.xlu0 %v56_v5, %s232_s12  ;;  %v57_v10 = vld [vmem:[#allocation2 + $0x8] sm:$0xff]  ;;  %s233_s0 = smov 112   ;;  %vm64_vm2 = vcmask 130048   ;;  %vm98_vm3 = vcmask 7168   ;;  %s234_s13 = smov 127   ;;  %vm123_vm4 = vcmask 1039360  }
   0x7   :  { %v24_v1 = vand.u32 127, %v23_v0  ;;  %vm78_vm5 = vcmask 916480   ;;  %s235_s14 = smov [#allocation5]   ;;  %s149_s18 = sshll.u32 %s256_s1, 4  ;;  %vm140_vm6 = vcmask 8192   ;;  %s150_s18 = int_to_ptr.hbm [resolvable:$true] %s149_s18 }
   0x8   :  { %s147_s15 = sshll.u32 %s235_s14, 4  ;;  %s148_s15 = int_to_ptr.vmem [resolvable:$true] %s147_s15 }
   0x9   :  { %v25_v2 = vadd.s32 128, %v24_v1  ;;  %v30_v3 = vand.u32 15, %v24_v1 }
   0xb   :  { %v37_v4 = vand.u32 15, %v25_v2  ;;  %vm50_vm0 = vcmp.ne.s32.totalorder %v30_v3, 15 }
   0xc   :  { %v159_v7 = vsel %vm50_vm0, 1.0, %v230_v6 }
   0xd   :  { %vm51_vm1 = vcmp.ne.s32.totalorder %v37_v4, 15 }
   0xe   :  { %v160_v8 = vsel %vm51_vm1, 1.0, %v230_v6  ;;  %62 = vrot.lane.b32.xlu1 %v57_v10, %s231_s11  ;;  %96 = vrot.lane.b32.xlu0 %v57_v10, %s232_s12 }
   0xf   :  { %v172_v9 = vpack.i.bf16 %v160_v8, %v159_v7 }
  0x11   :  { %173 = vrot.lane.b32.xlu2 %v172_v9, %s232_s12 }
  0x6b   :  { %v174_v11 = vpop.permute.xlu2 %173 }
  0x6c   :  { %v175_v12 = vunpack.i.l.bf16 %v174_v11  ;;  %v176_v19 = vunpack.i.h.bf16 %v174_v11 }
  0x6e   :  { %v110_v25 = vsel %vm98_vm3, %v175_v12, %v176_v19 }
  0x78   :  { %v61_v13 = vpop.permute.xlu1 %60  ;;  %v95_v14 = vpop.permute.xlu0 %94 }
  0x79   :  { %v68_v15 = vsub.f32 %v56_v5, %v61_v13  ;;  %v102_v16 = vsub.f32 %v56_v5, %v95_v14 }
  0x7b   :  { %v70_v17 = vmul.f32 %v68_v15, %v68_v15  ;;  %v113_v18 = vmul.f32 %v175_v12, %v102_v16 }
  0x7d   :  { %74 = vrot.lane.b32.xlu2 %v70_v17, %s233_s0  ;;  %v115_v20 = vmul.f32 %v113_v18, %v113_v18 }
  0x7f   :  { %119 = vrot.lane.b32.xlu1 %v115_v20, %s234_s13 }
  0x80   :  { %v63_v21 = vpop.permute.xlu1 %62  ;;  %v97_v22 = vpop.permute.xlu0 %96 }
  0x81   :  { %v65_v23 = vsel %vm64_vm2, %v61_v13, %v63_v21  ;;  %v99_v24 = vsel %vm98_vm3, %v95_v14, %v97_v22 }
  0x82   :  { %v69_v26 = vsub.f32 %v57_v10, %v65_v23  ;;  %v103_v27 = vsub.f32 %v57_v10, %v99_v24 }
  0x84   :  { %v71_v28 = vmul.f32 %v69_v26, %v69_v26  ;;  %v114_v29 = vmul.f32 %v110_v25, %v103_v27 }
  0x86   :  { %76 = vrot.lane.b32.xlu0 %v71_v28, %s233_s0  ;;  %v116_v30 = vmul.f32 %v114_v29, %v114_v29 }
  0x88   :  { %121 = vrot.lane.b32.xlu2 %v116_v30, %s234_s13 }
  0xd7   :  { %v75_v31 = vpop.permute.xlu2 %74 }
  0xe2   :  { %v122_v32 = vpop.permute.xlu2 %121 }
  0xe3   :  { %v127_v34 = vsel %vm123_vm4, %v122_v32, 0.0 }
  0xf1   :  { %v120_v33 = vpop.permute.xlu1 %119 }
  0xf2   :  { %v124_v35 = vsel %vm123_vm4, %v120_v33, %v122_v32 }
  0xf3   :  { %v128_v36 = vadd.f32 %v127_v34, %v124_v35 }
  0xf5   :  { %129 = vadd.xlane.f32.xlu1 %v128_v36 }
  0xf8   :  { %v77_v37 = vpop.permute.xlu0 %76 }
  0xf9   :  { %v79_v38 = vsel %vm78_vm5, %v75_v31, %v77_v37  ;;  %v82_v39 = vsel %vm78_vm5, %v77_v37, 0.0 }
  0xfa   :  { %v83_v40 = vadd.f32 %v82_v39, %v79_v38 }
  0xfc   :  { %84 = vadd.xlane.f32.xlu0 %v83_v40 }
 0x168   :  { %v130_v41 = vpop.xlane.xlu1 %129 }
 0x169   :  { %v131_v42 = vrot.slane %v130_v41, 4 }
 0x16b   :  { %v132_v43 = vadd.f32 %v131_v42, %v130_v41 }
 0x16d   :  { %v133_v44 = vrot.slane %v132_v43, 2 }
 0x16f   :  { %v85_v45 = vpop.xlane.xlu0 %84  ;;  %v134_v48 = vadd.f32 %v133_v44, %v132_v43 }
 0x170   :  { %v86_v46 = vrot.slane %v85_v45, 4 }
 0x171   :  { %v135_v51 = vrot.slane %v134_v48, 1 }
 0x172   :  { %v87_v47 = vadd.f32 %v86_v46, %v85_v45 }
 0x173   :  { %v136_v54 = vadd.f32 %v135_v51, %v134_v48 }
 0x174   :  { %v88_v49 = vrot.slane %v87_v47, 2 }
 0x176   :  { %v89_v50 = vadd.f32 %v88_v49, %v87_v47 }
 0x178   :  { %v90_v52 = vrot.slane %v89_v50, 1 }
 0x17a   :  { %v91_v53 = vadd.f32 %v90_v52, %v89_v50 }
 0x17c   :  { %161 = vpush %v91_v53 }
 0x17d   :  { %163 = vpush %v136_v54 }
 0x1ad   :  { %s162_s19 = spop %161 }
 0x1ae   :  { %v93_v55 = vstv %s162_s19  ;;  %s164_s20 = spop %163 }
 0x1af   :  { %v138_v56 = vstv %s164_s20 }
 0x1b0   :  { %v139_v57 = vsel %vm98_vm3, %v93_v55, %v138_v56 }
 0x1b1   :  { %141 = vst.msk [vmem:[#allocation5] sm:$0x1] %vm140_vm6, %v139_v57 }
 0x1b2   :  { %152 = dma.vmem_to_hbm [thread:$0]  %s148_s15, 16, %s150_s18, [#allocation4]  }
 0x1b3   :  { %227 = dma.done.wait [#allocation4], 16  }
 0x1b4   :  { %228 = vsyncadd [#allocation4], 4294967280 }
 0x1b5   :  { %157 = vsyncpa [#allocation3], 1 }
 0x1b6   :  { %158 = vsyncpa [#allocation4], 1 }

</bundles_post_ra>
